<compile_context>
chip_gen: v7x
topology: tpu7x:2x2x1
jax: 0.10.0
libtpu: 0.0.40
codegen_flags: <defaults>
</compile_context>

<pallas_src>
import functools

import jax
import jax.numpy as jnp
from jax.experimental import pallas as pl
from jax.experimental.pallas import tpu as pltpu

HIDDEN = 36           # self.hidden_size in the PyTorch module
D_PAD = 128           # lane-padded feature width used inside the kernel
VOCAB = 22            # 20 amino acids + pad(0) + unk(1)
V_PAD = 128           # lane-padded vocab width for the one-hot matmul

# ------------------------------------------------------------------ tokenizer
# TODO(synk): EnzymeTokenizer is external; this is a deterministic stand-in
#             (char -> id, pad-to-longest-in-batch capped at max_seq_length).
_AA = "ACDEFGHIKLMNPQRSTVWY"
_AA_VOCAB = {c: i + 2 for i, c in enumerate(_AA)}


def tokenize(batch_seqs, max_seq_length=768):
    max_len = min(max(len(s) for s in batch_seqs), max_seq_length)
    ids, masks = [], []
    for s in batch_seqs:
        t = [_AA_VOCAB.get(ch, 1) for ch in s[:max_len]]
        m = [1] * len(t) + [0] * (max_len - len(t))
        t = t + [0] * (max_len - len(t))
        ids.append(t)
        masks.append(m)
    return ids, masks


def _pad_to(a, shape):
    pads = [(0, t - s) for s, t in zip(a.shape, shape)]
    return jnp.pad(a, pads)


# ------------------------------------------------------------------ kernel
def _se3_band_kernel(cm_ref, tqkv_ref, wo_ref, o_ref, *, bt, dpad, vpad):
    """Bt batch elements of the banded SE(3)-invariant attention layer.

    cm_ref:   (Bt, N, 8) f32  packed [cx, cy, cz, mask, token_id, 0, 0, 0]
    tqkv_ref: (Vp, 3*Dp) bf16 resident fused table  embed @ [wq*scale|wk|wv]
    wo_ref:   (Dp, Dp)   bf16 resident output projection
    o_ref:    (Bt, N, Dp) bf16 degree-0 output (valid part is [..., :36])
    """
    tqkv = tqkv_ref[...]          # load once, reused across the Bt elements
    wo = wo_ref[...]

    for b in range(bt):           # static unroll over batch elements in block
        cm = cm_ref[b]            # (N, 8) f32
        n = cm.shape[0]
        c = cm[:, 0:3]            # (N, 3) CA coordinates
        m = cm[:, 3:4]            # (N, 1) padding mask
        ids = cm[:, 4:5].astype(jnp.int32)   # (N, 1) token ids (exact ints)

        # Embedding gather + fused scaled-QKV projection as ONE bf16 matmul:
        # one_hot(ids) @ (embed @ [wq*scale | wk | wv])   ->   (N, 3*Dp) f32
        lane = jax.lax.broadcasted_iota(jnp.int32, (n, vpad), 1)
        onehot = jnp.where(lane == ids, 1.0, 0.0).astype(jnp.bfloat16)
        qkv = jnp.dot(onehot, tqkv, preferred_element_type=jnp.float32)
        q = qkv[:, :dpad]                 # scale already folded into the table
        k = qkv[:, dpad:2 * dpad]
        v = qkv[:, 2 * dpad:]

        # Chain adjacency |i-j| <= 1  =>  row i only sees rows {i-1, i, i+1}.
        # Shifted neighbor rows via XLU sublane rotate; cyclic wrap-around
        # rows are killed by the boundary mask below.
        k_prev = pltpu.roll(k, shift=1, axis=0)        # row i -> k[i-1]
        k_next = pltpu.roll(k, shift=n - 1, axis=0)    # row i -> k[i+1]
        v_prev = pltpu.roll(v, shift=1, axis=0)
        v_next = pltpu.roll(v, shift=n - 1, axis=0)
        c_prev = pltpu.roll(c, shift=1, axis=0)
        c_next = pltpu.roll(c, shift=n - 1, axis=0)
        m_prev = pltpu.roll(m, shift=1, axis=0)
        m_next = pltpu.roll(m, shift=n - 1, axis=0)

        # SE(3)-invariant per-edge squared distances, (N, 1) each (f32 VPU).
        d2_prev = jnp.sum((c - c_prev) ** 2, axis=-1, keepdims=True)
        d2_next = jnp.sum((c - c_next) ** 2, axis=-1, keepdims=True)

        # Band logits, (N, 1) each (scale already in q).
        l_self = jnp.sum(q * k, axis=-1, keepdims=True)
        l_prev = jnp.sum(q * k_prev, axis=-1, keepdims=True) - d2_prev
        l_next = jnp.sum(q * k_next, axis=-1, keepdims=True) - d2_next

        # Validity: chain boundaries AND both endpoints unmasked.
        row = jax.lax.broadcasted_iota(jnp.int32, (n, 1), 0)
        valid = m > 0.5
        ok_prev = (row > 0) & valid & (m_prev > 0.5)
        ok_next = (row < n - 1) & valid & (m_next > 0.5)

        neg = jnp.float32(-1e30)
        l_self = jnp.where(valid, l_self, neg)
        l_prev = jnp.where(ok_prev, l_prev, neg)
        l_next = jnp.where(ok_next, l_next, neg)

        # 3-way masked softmax per row (stable: max-subtract), f32.
        mx = jnp.maximum(jnp.maximum(l_self, l_prev), l_next)
        e_self = jnp.exp(l_self - mx)
        e_prev = jnp.exp(l_prev - mx)
        e_next = jnp.exp(l_next - mx)
        inv = pl.reciprocal(e_self + e_prev + e_next, approx=True)

        ctx = (e_self * v + e_prev * v_prev + e_next * v_next) * inv   # (N, Dp)
        out = jnp.dot(ctx.astype(jnp.bfloat16), wo,
                      preferred_element_type=jnp.float32)
        o_ref[b] = (out * m).astype(o_ref.dtype)      # zero padded rows, bf16


def se3_band_forward(cm, table_qkv, wo_p, *, bt, dpad):
    """cm: (Bp, N, 8) f32 packed inputs; returns (Bp, N, Dp) bf16."""
    Bp, N, _ = cm.shape
    vpad = table_qkv.shape[0]
    kernel = functools.partial(_se3_band_kernel, bt=bt, dpad=dpad, vpad=vpad)
    return pl.pallas_call(
        kernel,
        out_shape=jax.ShapeDtypeStruct((Bp, N, dpad), jnp.bfloat16),
        grid_spec=pltpu.PrefetchScalarGridSpec(
            num_scalar_prefetch=0,
            grid=(Bp // bt,),
            in_specs=[
                pl.BlockSpec((bt, N, 8), lambda g: (g, 0, 0)),      # packed cm
                pl.BlockSpec((vpad, 3 * dpad), lambda g: (0, 0)),   # table (resident)
                pl.BlockSpec((dpad, dpad), lambda g: (0, 0)),       # wo (resident)
            ],
            out_specs=pl.BlockSpec((bt, N, dpad), lambda g: (g, 0, 0)),
        ),
        compiler_params=pltpu.CompilerParams(
            dimension_semantics=("parallel",)),
    )(cm, table_qkv, wo_p)


# ------------------------------------------------------------------ wrapper
class ProteinSE3EncoderPallas:
    """Deterministic synthetic parameters, Pallas banded-attention forward."""

    def __init__(self, key, hidden=HIDDEN, vocab=VOCAB, max_seq_length=768,
                 d_pad=D_PAD, v_pad=V_PAD):
        self.hidden_size = hidden
        self.max_seq_length = max_seq_length
        self.d_pad = d_pad
        ks = jax.random.split(key, 5)
        s = 1.0 / jnp.sqrt(jnp.float32(hidden))
        self.embed = jax.random.normal(ks[0], (vocab, hidden), jnp.float32) * s
        self.wq = jax.random.normal(ks[1], (hidden, hidden), jnp.float32) * s
        self.wk = jax.random.normal(ks[2], (hidden, hidden), jnp.float32) * s
        self.wv = jax.random.normal(ks[3], (hidden, hidden), jnp.float32) * s
        self.wo = jax.random.normal(ks[4], (hidden, hidden), jnp.float32) * s

        # Fused, pre-scaled embedding+QKV table and output projection, padded
        # to lane-dense widths and stored bf16 (MXU-native; f32 accumulation
        # inside the kernel).  Padding rows/cols are exact zeros.
        scale = float(hidden) ** -0.5
        eq = (self.embed @ self.wq) * scale
        ek = self.embed @ self.wk
        ev = self.embed @ self.wv
        self.table_qkv = jnp.concatenate(
            [_pad_to(eq, (v_pad, d_pad)),
             _pad_to(ek, (v_pad, d_pad)),
             _pad_to(ev, (v_pad, d_pad))], axis=1).astype(jnp.bfloat16)
        self.wo_p = _pad_to(self.wo, (d_pad, d_pad)).astype(jnp.bfloat16)

    def forward(self, batch_seqs, batch_coords):
        # ---- glue, mirrors the PyTorch forward ----
        input_ids, masks = tokenize(batch_seqs, self.max_seq_length)
        ids = jnp.asarray(input_ids, jnp.int32)        # (B, L)
        m = jnp.asarray(masks, jnp.float32)            # (B, L)
        B, L = ids.shape

        padded_coords = []
        for coords in batch_coords:
            ca = [c[1] for c in coords]                # take CA coord
            if len(ca) > L:
                ca = ca[:L]
            elif len(ca) < L:
                ca = ca + [[0.0, 0.0, 0.0]] * (L - len(ca))
            padded_coords.append(ca)
        coords = jnp.asarray(padded_coords, jnp.float32)   # (B, L, 3)

        # Sequence axis -> multiple of 16 (bf16 sublane packing); extra rows
        # are masked and sliced away again below (no semantic change).
        N = max(16, -(-L // 16) * 16)
        if N != L:
            ids = jnp.pad(ids, ((0, 0), (0, N - L)))
            m = jnp.pad(m, ((0, 0), (0, N - L)))
            coords = jnp.pad(coords, ((0, 0), (0, N - L), (0, 0)))

        # Pack coords + mask + token id into one sublane-aligned (B, N, 8)
        # f32 input (small ids are exactly representable in f32).
        cm = jnp.concatenate(
            [coords, m[..., None], ids[..., None].astype(jnp.float32),
             jnp.zeros((B, N, 3), jnp.float32)], axis=-1)

        # Batch blocking: Bt elements per grid step amortizes per-step
        # pipeline overhead; keep >=2 grid steps whenever B >= 2 so both v7x
        # TensorCores get work on the "parallel" axis.
        if B >= 8:
            bt = 4
        elif B >= 4:
            bt = 2
        else:
            bt = 1
        Bp = -(-B // bt) * bt
        if Bp != B:
            cm = jnp.pad(cm, ((0, Bp - B), (0, 0), (0, 0)))

        # ---- hot path: Pallas banded SE(3)-invariant attention kernel ----
        h = se3_band_forward(cm, self.table_qkv, self.wo_p,
                             bt=bt, dpad=self.d_pad)
        return h[:B, :L, :self.hidden_size].astype(jnp.float32)

    # pure-JAX dense f32 reference of the kernel math, for correctness checks
    def forward_ref(self, batch_seqs, batch_coords):
        input_ids, masks = tokenize(batch_seqs, self.max_seq_length)
        ids = jnp.asarray(input_ids, jnp.int32)
        m = jnp.asarray(masks, jnp.float32)
        N = ids.shape[1]
        pc = []
        for coords in batch_coords:
            ca = [c[1] for c in coords]
            ca = ca[:N] + [[0.0, 0.0, 0.0]] * max(0, N - len(ca))
            pc.append(ca)
        c = jnp.asarray(pc, jnp.float32)
        i = jnp.arange(N)
        adj = ((i[:, None] >= i[None, :] - 1) &
               (i[:, None] <= i[None, :] + 1)).astype(jnp.float32)
        x = jnp.take(self.embed, ids, axis=0)
        q = x @ self.wq; k = x @ self.wk; v = x @ self.wv
        d2 = jnp.sum((c[:, :, None, :] - c[:, None, :, :]) ** 2, axis=-1)
        logits = jnp.einsum("bid,bjd->bij", q, k) / jnp.sqrt(
            jnp.float32(self.hidden_size)) - d2
        pair = adj[None] * m[:, :, None] * m[:, None, :]
        logits = jnp.where(pair > 0.5, logits, -1e30)
        p = jax.nn.softmax(logits, axis=-1)
        out = jnp.einsum("bij,bjd->bid", p, v) @ self.wo
        return out * m[:, :, None]


# ------------------------------------------------------------------ main
if __name__ == "__main__":
    key = jax.random.PRNGKey(0)
    pkey, ckey = jax.random.split(key)

    model = ProteinSE3EncoderPallas(pkey)

    # Small deterministic example: batch=2 sequences, seq length up to 8.
    batch_seqs = ["ACDEFGHI", "MKTWY"]
    max_len = max(len(s) for s in batch_seqs)

    raw_coords = jax.random.normal(ckey, (2, max_len, 3), jnp.float32)
    batch_coords = []
    for b, s in enumerate(batch_seqs):
        residues = []
        for n in range(len(s)):
            residues.append(("CA", [float(v) for v in raw_coords[b, n]]))
        batch_coords.append(residues)

    h = model.forward(batch_seqs, batch_coords)
    h = jax.block_until_ready(h)

    h_ref = model.forward_ref(batch_seqs, batch_coords)
    assert h.shape == (2, max_len, HIDDEN), h.shape
    # 1e-2 tolerance: bf16 MXU operands + pl.reciprocal(approx=True) in the
    # kernel vs. an all-f32 dense reference.
    assert jnp.allclose(h, h_ref, atol=1e-2, rtol=1e-2), "mismatch vs JAX reference"

    print("KERNEL_OK")
</pallas_src>

<mosaic_0001>
module attributes {stable_mosaic.version = 11 : i64} {
  func.func @_se3_band_kernel(%arg0: i32, %arg1: memref<1x16x8xf32, #tpu.memory_space<vmem>>, %arg2: memref<128x384xbf16, #tpu.memory_space<vmem>>, %arg3: memref<128x128xbf16, #tpu.memory_space<vmem>>, %arg4: memref<1x16x128xbf16, #tpu.memory_space<vmem>>) attributes {dimension_semantics = [#tpu.dimension_semantics<parallel>], iteration_bounds = array<i64: 2>, scalar_prefetch = 0 : i64, scratch_operands = 0 : i64, tpu.core_type = #tpu.core_type<tc>, window_params = [{transform_indices = @transform_0, window_bounds = array<i64: 1, 16, 8>}, {pipeline_mode = #tpu.pipeline_mode<synchronous>, transform_indices = @transform_1, window_bounds = array<i64: 128, 384>}, {pipeline_mode = #tpu.pipeline_mode<synchronous>, transform_indices = @transform_2, window_bounds = array<i64: 128, 128>}, {transform_indices = @transform_3, window_bounds = array<i64: 1, 16, 128>}]} {
    %c0 = arith.constant 0 : index
    %c0_0 = arith.constant 0 : index
    %0 = vector.load %arg2[%c0, %c0_0] : memref<128x384xbf16, #tpu.memory_space<vmem>>, vector<128x384xbf16>
    %c0_1 = arith.constant 0 : index
    %c0_2 = arith.constant 0 : index
    %1 = vector.load %arg3[%c0_1, %c0_2] : memref<128x128xbf16, #tpu.memory_space<vmem>>, vector<128x128xbf16>
    %c0_3 = arith.constant 0 : index
    %c0_4 = arith.constant 0 : index
    %c0_5 = arith.constant 0 : index
    %2 = vector.load %arg1[%c0_3, %c0_4, %c0_5] : memref<1x16x8xf32, #tpu.memory_space<vmem>>, vector<1x16x8xf32>
    %3 = vector.shape_cast %2 : vector<1x16x8xf32> to vector<16x8xf32>
    %4 = vector.extract_strided_slice %3 {offsets = [0, 0], sizes = [16, 3], strides = [1, 1]} : vector<16x8xf32> to vector<16x3xf32>
    %5 = vector.extract_strided_slice %3 {offsets = [0, 3], sizes = [16, 1], strides = [1, 1]} : vector<16x8xf32> to vector<16x1xf32>
    %6 = vector.extract_strided_slice %3 {offsets = [0, 4], sizes = [16, 1], strides = [1, 1]} : vector<16x8xf32> to vector<16x1xf32>
    %7 = arith.fptosi %6 : vector<16x1xf32> to vector<16x1xi32>
    %8 = tpu.iota {dimensions = array<i32: 1>} : vector<16x128xi32>
    %9 = vector.broadcast %7 : vector<16x1xi32> to vector<16x128xi32>
    %10 = arith.cmpi eq, %8, %9 : vector<16x128xi32>
    %cst = arith.constant 1.000000e+00 : f32
    %cst_6 = arith.constant 0.000000e+00 : f32
    %11 = vector.broadcast %cst : f32 to vector<16x128xf32>
    %12 = vector.broadcast %cst_6 : f32 to vector<16x128xf32>
    %13 = arith.select %10, %11, %12 : vector<16x128xi1>, vector<16x128xf32>
    %14 = arith.truncf %13 : vector<16x128xf32> to vector<16x128xbf16>
    %cst_7 = arith.constant dense<0.000000e+00> : vector<16x384xf32>
    %15 = tpu.matmul %14, %0, %cst_7 {dimension_numbers = #tpu.dot_dimension_numbers<[1], [0], [0], [1], [0, 0, 1, 1], [], []>} : vector<16x128xbf16>, vector<128x384xbf16>, vector<16x384xf32> -> vector<16x384xf32>
    %16 = vector.extract_strided_slice %15 {offsets = [0, 0], sizes = [16, 128], strides = [1, 1]} : vector<16x384xf32> to vector<16x128xf32>
    %17 = vector.extract_strided_slice %15 {offsets = [0, 128], sizes = [16, 128], strides = [1, 1]} : vector<16x384xf32> to vector<16x128xf32>
    %18 = vector.extract_strided_slice %15 {offsets = [0, 256], sizes = [16, 128], strides = [1, 1]} : vector<16x384xf32> to vector<16x128xf32>
    %c1_i32 = arith.constant 1 : i32
    %19 = tpu.dynamic_rotate %17 by %c1_i32 dim 0 : vector<16x128xf32>, i32 -> vector<16x128xf32>
    %c15_i32 = arith.constant 15 : i32
    %20 = tpu.dynamic_rotate %17 by %c15_i32 dim 0 : vector<16x128xf32>, i32 -> vector<16x128xf32>
    %c1_i32_8 = arith.constant 1 : i32
    %21 = tpu.dynamic_rotate %18 by %c1_i32_8 dim 0 : vector<16x128xf32>, i32 -> vector<16x128xf32>
    %c15_i32_9 = arith.constant 15 : i32
    %22 = tpu.dynamic_rotate %18 by %c15_i32_9 dim 0 : vector<16x128xf32>, i32 -> vector<16x128xf32>
    %c1_i32_10 = arith.constant 1 : i32
    %23 = tpu.dynamic_rotate %4 by %c1_i32_10 dim 0 : vector<16x3xf32>, i32 -> vector<16x3xf32>
    %c15_i32_11 = arith.constant 15 : i32
    %24 = tpu.dynamic_rotate %4 by %c15_i32_11 dim 0 : vector<16x3xf32>, i32 -> vector<16x3xf32>
    %c1_i32_12 = arith.constant 1 : i32
    %25 = tpu.dynamic_rotate %5 by %c1_i32_12 dim 0 : vector<16x1xf32>, i32 -> vector<16x1xf32>
    %c15_i32_13 = arith.constant 15 : i32
    %26 = tpu.dynamic_rotate %5 by %c15_i32_13 dim 0 : vector<16x1xf32>, i32 -> vector<16x1xf32>
    %27 = arith.subf %4, %23 : vector<16x3xf32>
    %28 = arith.mulf %27, %27 : vector<16x3xf32>
    %cst_14 = arith.constant dense<0.000000e+00> : vector<16xf32>
    %29 = vector.multi_reduction <add>, %28, %cst_14 [1] : vector<16x3xf32> to vector<16xf32>
    %30 = vector.shape_cast %29 : vector<16xf32> to vector<16x1xf32>
    %31 = arith.subf %4, %24 : vector<16x3xf32>
    %32 = arith.mulf %31, %31 : vector<16x3xf32>
    %cst_15 = arith.constant dense<0.000000e+00> : vector<16xf32>
    %33 = vector.multi_reduction <add>, %32, %cst_15 [1] : vector<16x3xf32> to vector<16xf32>
    %34 = vector.shape_cast %33 : vector<16xf32> to vector<16x1xf32>
    %35 = arith.mulf %16, %17 : vector<16x128xf32>
    %cst_16 = arith.constant dense<0.000000e+00> : vector<16xf32>
    %36 = vector.multi_reduction <add>, %35, %cst_16 [1] : vector<16x128xf32> to vector<16xf32>
    %37 = vector.shape_cast %36 : vector<16xf32> to vector<16x1xf32>
    %38 = arith.mulf %16, %19 : vector<16x128xf32>
    %cst_17 = arith.constant dense<0.000000e+00> : vector<16xf32>
    %39 = vector.multi_reduction <add>, %38, %cst_17 [1] : vector<16x128xf32> to vector<16xf32>
    %40 = vector.shape_cast %39 : vector<16xf32> to vector<16x1xf32>
    %41 = arith.subf %40, %30 : vector<16x1xf32>
    %42 = arith.mulf %16, %20 : vector<16x128xf32>
    %cst_18 = arith.constant dense<0.000000e+00> : vector<16xf32>
    %43 = vector.multi_reduction <add>, %42, %cst_18 [1] : vector<16x128xf32> to vector<16xf32>
    %44 = vector.shape_cast %43 : vector<16xf32> to vector<16x1xf32>
    %45 = arith.subf %44, %34 : vector<16x1xf32>
    %46 = tpu.iota {dimensions = array<i32: 0>} : vector<16x1xi32>
    %cst_19 = arith.constant 5.000000e-01 : f32
    %47 = vector.broadcast %cst_19 : f32 to vector<16x1xf32>
    %48 = arith.cmpf ogt, %5, %47 : vector<16x1xf32>
    %c0_i32 = arith.constant 0 : i32
    %49 = vector.broadcast %c0_i32 : i32 to vector<16x1xi32>
    %50 = arith.cmpi sgt, %46, %49 : vector<16x1xi32>
    %51 = arith.andi %50, %48 : vector<16x1xi1>
    %cst_20 = arith.constant 5.000000e-01 : f32
    %52 = vector.broadcast %cst_20 : f32 to vector<16x1xf32>
    %53 = arith.cmpf ogt, %25, %52 : vector<16x1xf32>
    %54 = arith.andi %51, %53 : vector<16x1xi1>
    %c15_i32_21 = arith.constant 15 : i32
    %55 = vector.broadcast %c15_i32_21 : i32 to vector<16x1xi32>
    %56 = arith.cmpi slt, %46, %55 : vector<16x1xi32>
    %57 = arith.andi %56, %48 : vector<16x1xi1>
    %cst_22 = arith.constant 5.000000e-01 : f32
    %58 = vector.broadcast %cst_22 : f32 to vector<16x1xf32>
    %59 = arith.cmpf ogt, %26, %58 : vector<16x1xf32>
    %60 = arith.andi %57, %59 : vector<16x1xi1>
    %cst_23 = arith.constant -1.000000e+30 : f32
    %61 = vector.broadcast %cst_23 : f32 to vector<16x1xf32>
    %62 = arith.select %48, %37, %61 : vector<16x1xi1>, vector<16x1xf32>
    %cst_24 = arith.constant -1.000000e+30 : f32
    %63 = vector.broadcast %cst_24 : f32 to vector<16x1xf32>
    %64 = arith.select %54, %41, %63 : vector<16x1xi1>, vector<16x1xf32>
    %cst_25 = arith.constant -1.000000e+30 : f32
    %65 = vector.broadcast %cst_25 : f32 to vector<16x1xf32>
    %66 = arith.select %60, %45, %65 : vector<16x1xi1>, vector<16x1xf32>
    %67 = arith.maximumf %62, %64 : vector<16x1xf32>
    %68 = arith.maximumf %67, %66 : vector<16x1xf32>
    %69 = arith.subf %62, %68 : vector<16x1xf32>
    %70 = math.exp %69 : vector<16x1xf32>
    %71 = arith.subf %64, %68 : vector<16x1xf32>
    %72 = math.exp %71 : vector<16x1xf32>
    %73 = arith.subf %66, %68 : vector<16x1xf32>
    %74 = math.exp %73 : vector<16x1xf32>
    %75 = arith.addf %70, %72 : vector<16x1xf32>
    %76 = arith.addf %75, %74 : vector<16x1xf32>
    %77 = tpu.reciprocal %76 {approx = true} : vector<16x1xf32> -> vector<16x1xf32>
    %78 = vector.broadcast %70 : vector<16x1xf32> to vector<16x128xf32>
    %79 = arith.mulf %78, %18 : vector<16x128xf32>
    %80 = vector.broadcast %72 : vector<16x1xf32> to vector<16x128xf32>
    %81 = arith.mulf %80, %21 : vector<16x128xf32>
    %82 = arith.addf %79, %81 : vector<16x128xf32>
    %83 = vector.broadcast %74 : vector<16x1xf32> to vector<16x128xf32>
    %84 = arith.mulf %83, %22 : vector<16x128xf32>
    %85 = arith.addf %82, %84 : vector<16x128xf32>
    %86 = vector.broadcast %77 : vector<16x1xf32> to vector<16x128xf32>
    %87 = arith.mulf %85, %86 : vector<16x128xf32>
    %88 = arith.truncf %87 : vector<16x128xf32> to vector<16x128xbf16>
    %cst_26 = arith.constant dense<0.000000e+00> : vector<16x128xf32>
    %89 = tpu.matmul %88, %1, %cst_26 {dimension_numbers = #tpu.dot_dimension_numbers<[1], [0], [0], [1], [0, 0, 1, 1], [], []>} : vector<16x128xbf16>, vector<128x128xbf16>, vector<16x128xf32> -> vector<16x128xf32>
    %90 = vector.broadcast %5 : vector<16x1xf32> to vector<16x128xf32>
    %91 = arith.mulf %89, %90 : vector<16x128xf32>
    %92 = arith.truncf %91 : vector<16x128xf32> to vector<16x128xbf16>
    %c0_27 = arith.constant 0 : index
    %c0_28 = arith.constant 0 : index
    %c0_29 = arith.constant 0 : index
    %93 = vector.load %arg4[%c0_27, %c0_28, %c0_29] : memref<1x16x128xbf16, #tpu.memory_space<vmem>>, vector<1x16x128xbf16>
    %94 = vector.shape_cast %93 : vector<1x16x128xbf16> to vector<16x128xbf16>
    %95 = vector.shape_cast %92 : vector<16x128xbf16> to vector<1x16x128xbf16>
    tpu.vector_store %arg4[%c0_27, %c0_28, %c0_29], %95 {strides = array<i32>} : memref<1x16x128xbf16, #tpu.memory_space<vmem>>, vector<1x16x128xbf16>,
    return
  }
  func.func @transform_0(%arg0: i32) -> (i32, i32, i32) {
    %c0_i32 = arith.constant 0 : i32
    %c0_i32_0 = arith.constant 0 : i32
    %c0_i32_1 = arith.constant 0 : i32
    return %arg0, %c0_i32, %c0_i32_0 : i32, i32, i32
  }
  func.func @transform_1(%arg0: i32) -> (i32, i32) {
    %c0_i32 = arith.constant 0 : i32
    %c0_i32_0 = arith.constant 0 : i32
    %c0_i32_1 = arith.constant 0 : i32
    return %c0_i32, %c0_i32_0 : i32, i32
  }
  func.func @transform_2(%arg0: i32) -> (i32, i32) {
    %c0_i32 = arith.constant 0 : i32
    %c0_i32_0 = arith.constant 0 : i32
    %c0_i32_1 = arith.constant 0 : i32
    return %c0_i32, %c0_i32_0 : i32, i32
  }
  func.func @transform_3(%arg0: i32) -> (i32, i32, i32) {
    %c0_i32 = arith.constant 0 : i32
    %c0_i32_0 = arith.constant 0 : i32
    %c0_i32_1 = arith.constant 0 : i32
    return %arg0, %c0_i32, %c0_i32_0 : i32, i32, i32
  }
}

</mosaic_0001>

<bundles_post_ra>
// kernel: tpu_custom_call.1
= control target key start
LH: loop header
LB: loop body
LE: loop exit
PB: predicated region body
PF: predicated region fallthrough
CT: control target
= control target key end

     0   :  { %8 = vsyncpa [#allocation3], 0  ;;  %s1618_s0 = inlined_call_operand.vmem [shape: f32[2,16,8], index: 0, kind: input, shape index: {}]   ;;  %s1619_s1 = inlined_call_operand.hbm [shape: bf16[128,384], index: 1, kind: input, shape index: {}]   ;;  %s1620_s2 = inlined_call_operand.hbm [shape: bf16[128,128], index: 2, kind: input, shape index: {}]   ;;  %s1621_s3 = inlined_call_operand.hbm [shape: bf16[2,16,128], index: 3, kind: output, shape index: {}]  }
   0x1   :  { %9 = vsyncpa [#allocation6], 0 }
   0x2   :  { %10 = vsyncpa [#allocation4], 0 }
   0x3   :  { %12 = vsyncpa [#allocation4 + $0x1], 0  ;;  %s1316_s12 = smov 0   ;;  %s1318_s13 = smov 0  }
   0x4   :  { %s1320_s14 = smov 0   ;;  %s1322_s15 = smov 0  }
   0x5 LB: > { %s1337_s16 = sadd.s32 4294967295, %s1277_s15   ;;  %s893_s17 = sadd.s32 4294967294, %s1277_s15   ;;  %s1277_s15 = sphi %s1322_s15, %s1639_s15   ;;  %s1273_s14 = sphi %s1320_s14, %s1638_s14   ;;  %s1269_s13 = sphi %s1318_s13, %s1637_s13   ;;  %s1265_s12 = sphi %s1316_s12, %s1636_s12  }
   0x6   : > { %s1341_s18 = sadd.s32 1, %s1277_s15   ;;  %s93_s19 = sadd.s32 1, %s1273_s14 }
   0x7   : > { %s90_s20 = ssub.s32 %s1277_s15, %s1341_s18  ;;  %p103_p0 = scmp.ne.s32.totalorder %s1273_s14, %s1269_s13 }
   0x8   : > { %p91_p1 = scmp.eq.s32.totalorder %s90_s20, 0  ;;  %p104_p2 = scmp.eq.s32.totalorder %s1337_s16, 1 }
   0x9   : > { %p109_p3 = scmp.ne.s32.totalorder %s1269_s13, %s1265_s12  ;;  %p110_p4 = scmp.eq.s32.totalorder %s893_s17, 1 }
   0xa   : > { %s1352_s21 = scalar_select %p91_p1, %s1273_s14, %s93_s19  }
   0xb   : > { %p1354_p5 = por %p104_p2, %p103_p0  ;;  %p1358_p6 = por %p110_p4, %p109_p3 }
   0xc   : > { %p894_p7 = scmp.ge.s32.totalorder %s1277_s15, 1  ;;  %p117_p8 = scmp.lt.s32.totalorder %s1277_s15, 3 }
   0xd   : > { %s1625_s22 = scalar_select %p1354_p5, 1, 0 }
   0xe   : > { %s1626_s23 = scalar_select %p1358_p6, 1, 0 }
   0xf   : > { %p1622_p9 = scmp.eq.s32.totalorder %s1337_s16, 0  ;;  %p1365_p10 = pnand %p894_p7, %p117_p8 }
  0x10   : > { %s1279_s25 = smov [#allocation2]   ;;  %s1280_s28 = smov [#allocation5]  }
  0x11   : > { %s1627_s24 = scalar_select %p1365_p10, 1, 0 }
  0x12   : > { %s129_s26 = sshll.u32 %s1279_s25, 4  ;;  %p1028_p11 = pneg %p1365_p10  ;;  %s130_s26 = int_to_ptr.vmem [resolvable:$true] %s129_s26 }
  0x13   : > { %s142_s29 = sshll.u32 %s1280_s28, 4  ;;  %s1151_s5 = scalar_lea.hbm %s1619_s1, 3072  ;;  %s1377_s29 = int_to_ptr.vmem [resolvable:$true] %s142_s29 }
  0x14   : > { %p1373_p12 = pnand %p1622_p9, %p1028_p11  ;;  %p1152_p13 = scmp.ne.s32.totalorder %s1619_s1, %s1151_s5 }
  0x15   : > { %p1158_p3 = scmp.lt.u32.totalorder %s1151_s5, %s1619_s1 }
  0x16   : > { %p1153_p0 = pneg %p1373_p12 }
  0x18   : > { %p1154_p1 = pnand %p1153_p0, %p1152_p13 }
  0x1a   : > { %p1155_p2 = pneg %p1154_p1 }
  0x1c   : > { %p1160_p4 = pnand %p1158_p3, %p1155_p2 }
  0x1e   : > { %1163 = shalt.err (!%p1160_p4)
}
  0x1f   : > { %s1164_s10 = scalar_lea.vmem %s130_s26, 3072  ;;  %p1172_p9 = scmp.lt.s32.totalorder %s130_s26, %s130_s26 }
  0x20   : > { %p1165_p7 = scmp.ne.s32.totalorder %s130_s26, %s1164_s10  ;;  %p1173_p6 = scmp.lt.s32.totalorder %s1164_s10, %s1164_s10 }
  0x22   : > { %p1167_p8 = pnand %p1165_p7, %p1153_p0  ;;  %p1174_p5 = por %p1173_p6, %p1172_p9 }
  0x24   : > { %p1168_p11 = pneg %p1167_p8 }
  0x26   : > { %p1175_p10 = pnand %p1174_p5, %p1168_p11 }
  0x28   : > { %1178 = shalt.err (!%p1175_p10)
}
  0x29   : > { %s1281_s11 = smov 192   ;;  %s1282_s17 = smov 12  }
  0x2a   : > { %1031 = dma.hbm_to_vmem [thread:$0]  (!%p1373_p12), %s1619_s1, 3072, %s130_s26, [#allocation3], %s1281_s11, %s1281_s11, %s1282_s17  }
  0x2b   : > { %s1179_s30 = scalar_lea.hbm %s1620_s2, 1024 }
  0x2c   : > { %p1180_p13 = scmp.ne.s32.totalorder %s1620_s2, %s1179_s30  ;;  %p1186_p9 = scmp.lt.u32.totalorder %s1179_s30, %s1620_s2 }
  0x2e   : > { %p1182_p5 = pnand %p1180_p13, %p1153_p0 }
  0x30   : > { %p1183_p6 = pneg %p1182_p5 }
  0x32   : > { %p1188_p10 = pnand %p1186_p9, %p1183_p6 }
  0x34   : > { %1191 = shalt.err (!%p1188_p10)
}
  0x35   : > { %s1192_s26 = scalar_lea.vmem %s1377_s29, 1024  ;;  %p1200_p4 = scmp.lt.s32.totalorder %s1377_s29, %s1377_s29 }
  0x36   : > { %p1193_p1 = scmp.ne.s32.totalorder %s1377_s29, %s1192_s26  ;;  %p1201_p7 = scmp.lt.s32.totalorder %s1192_s26, %s1192_s26 }
  0x38   : > { %p1195_p2 = pnand %p1193_p1, %p1153_p0  ;;  %p1202_p8 = por %p1201_p7, %p1200_p4 }
  0x3a   : > { %p1196_p3 = pneg %p1195_p2 }
  0x3c   : > { %p1203_p11 = pnand %p1202_p8, %p1196_p3 }
  0x3e   : > { %1206 = shalt.err (!%p1203_p11)
}
  0x3f   : > { %s1283_s8 = smov 64   ;;  %s1284_s9 = smov 4  }
  0x40   : > { %1034 = dma.hbm_to_vmem [thread:$0]  (!%p1373_p12), %s1620_s2, 1024, %s1377_s29, [#allocation6], %s1283_s8, %s1283_s8, %s1284_s9  }
  0x41   : > { %p1629_p13 = scmp.ne.s32.totalorder %s1627_s24, 0 }
  0x42   : > { %p1630_p0 = scmp.eq.s32.totalorder (!%p1629_p13), %s1337_s16, 0 }
  0x43   : > { %166 = sbr.rel (%p1629_p13) target bundleno = 1001 (0x3e9), region = 32 }
  0x4a   : > { %1252 = dma.done.wait (%p1630_p0), [#allocation3], 3072   ;;  %p1631_p5 = pmov %p1630_p0 }
  0x4b   : > { %p1632_p6 = pmov %p1630_p0 }
  0x4c   : > { %1254 = vsyncadd (%p1631_p5), [#allocation3], 4294964224 }
  0x4d   : > { %1256 = dma.done.wait (%p1632_p6), [#allocation6], 1024   ;;  %p1633_p9 = pmov %p1630_p0 }
  0x4e   : > { %p194_p10 = scmp.lt.s32.totalorder %s1337_s16, 1  ;;  %v1285_v0 = vmov 4   ;;  %v1286_v1 = vmov 0.0   ;;  %v1095_v6 = vld [vmem:[#allocation2 + $0x4] ss:$12 sps:$4 sm:$0xff]   ;;  %v1287_v19 = vmov 0   ;;  %v252_v21 = vlaneseq }
  0x4f   : > { %1258 = vsyncadd (%p1633_p9), [#allocation6], 4294966272  ;;  %1092 = vset.pattern.permute.xlu0 %v1285_v0  ;;  %974 = vmatprep.subr.bf16.mxu1 %v1286_v1  ;;  %v1097_v7 = vld [vmem:[#allocation2] ss:$12 sps:$4 sm:$0xff]   ;;  %v1098_v8 = vld [vmem:[#allocation2 + $0x8] ss:$12 sps:$4 sm:$0xff]  }
  0x50   : > { %s195_s24 = scalar_select %p194_p10, %s1337_s16, 1  ;;  %393 = vmatprep.subr.bf16.mxu0 %v1095_v6  ;;  %v1099_v10 = vld [vmem:[#allocation2 + $0x1c] ss:$12 sps:$4 sm:$0xff]   ;;  %975 = vmatpush3.bf16.msra.mxu1 %v1098_v8  ;;  %v1101_v11 = vld [vmem:[#allocation2 + $0x18] ss:$12 sps:$4 sm:$0xff]   ;;  %vm1288_vm0 = vmmov 0  }
  0x51   : > { %394 = vmatpush1.bf16.msra.mxu0 %v1097_v7  ;;  %v1102_v13 = vld [vmem:[#allocation2 + $0x20] ss:$12 sps:$4 sm:$0xff]   ;;  %976 = vmatprep.subr.bf16.mxu1 %v1286_v1  ;;  %v1105_v15 = vld [vmem:[#allocation2 + $0x30] ss:$12 sps:$4 sm:$0xff]   ;;  %v1106_v16 = vld [vmem:[#allocation2 + $0x38] ss:$12 sps:$4 sm:$0xff]  }
  0x52   : > { %s947_s27 = sshll.u32 %s195_s24, 4  ;;  %395 = vmatprep.subr.bf16.mxu0 %v1099_v10  ;;  %v1103_v14 = vld [vmem:[#allocation2 + $0x34] ss:$12 sps:$4 sm:$0xff]   ;;  %v1107_v17 = vld [vmem:[#allocation2 + $0x4c] ss:$12 sps:$4 sm:$0xff]   ;;  %425 = vmatprep.mubr.bf16.mxu0 %v1287_v19  ;;  %v1454_v23 = vshrl.u32 %v252_v21, 7 }
  0x53   : > { %s198_s19 = scalar_lea.vmem %s1618_s0, %s947_s27  ;;  %v1109_v18 = vld [vmem:[#allocation2 + $0x48] ss:$12 sps:$4 sm:$0xff]   ;;  %990 = vmatprep.mubr.msk.bf16.mxu1 %vm1288_vm0, %v1286_v1  ;;  %v1110_v20 = vld [vmem:[#allocation2 + $0x50] ss:$12 sps:$4 sm:$0xff]   ;;  %v1113_v24 = vld [vmem:[#allocation2 + $0x60] ss:$12 sps:$4 sm:$0xff]  }
  0x54   : > { %v1442_v2 = vld [vmem:[%s198_s19] sm:$0xff]  ;;  %v1444_v3 = vld [vmem:[%s198_s19 + $0x8] sm:$0xff]  ;;  %977 = vmatpush3.bf16.msra.mxu1 %v1102_v13  ;;  %s1289_s20 = smov 125   ;;  %vm481_vm1 = vcmp.lt.s32.totalorder %v1454_v23, 1  ;;  %v1121_v30 = vld [vmem:[#allocation2 + $0x90] ss:$12 sps:$4 sm:$0xff]  }
  0x55   : > { %v1014_v4 = vtrunc.f32 %v1442_v2  ;;  %v1016_v5 = vtrunc.f32 %v1444_v3  ;;  %396 = vmatpush1.bf16.msra.mxu0 %v1101_v11  ;;  %978 = vmatprep.subr.bf16.mxu1 %v1286_v1  ;;  %v1111_v22 = vld [vmem:[#allocation2 + $0x64] ss:$12 sps:$4 sm:$0xff]   ;;  %v1114_v25 = vld [vmem:[#allocation2 + $0x68] ss:$12 sps:$4 sm:$0xff]   ;;  %v1118_v28 = vld [vmem:[#allocation2 + $0x80] ss:$12 sps:$4 sm:$0xff]  }
  0x56   : > { %397 = vmatprep.subr.bf16.mxu0 %v1103_v14  ;;  %507 = vrot.lane.b32.xlu1 %v1442_v2, %s1289_s20  ;;  %v1115_v26 = vld [vmem:[#allocation2 + $0x7c] ss:$12 sps:$4 sm:$0xff]   ;;  %v1117_v27 = vld [vmem:[#allocation2 + $0x78] ss:$12 sps:$4 sm:$0xff]   ;;  %v1119_v29 = vld [vmem:[#allocation2 + $0x94] ss:$12 sps:$4 sm:$0xff]  }
  0x57   : > { %v1015_v9 = vcvt.f32.s32 %v1014_v4  ;;  %v1017_v12 = vcvt.f32.s32 %v1016_v5  ;;  %v1122_v31 = vld [vmem:[#allocation2 + $0x98] ss:$12 sps:$4 sm:$0xff]   ;;  %v497_v32 = vrot.slane %v1442_v2, 7  ;;  %v498_v33 = vrot.slane %v1444_v3, 7  ;;  %v1125_v36 = vld [vmem:[#allocation2 + $0xa8] ss:$12 sps:$4 sm:$0xff]  }
  0x58   : > { %979 = vmatpush3.bf16.msra.mxu1 %v1106_v16  ;;  %v1123_v34 = vld [vmem:[#allocation2 + $0xac] ss:$12 sps:$4 sm:$0xff]   ;;  %v1126_v37 = vld [vmem:[#allocation2 + $0xb0] ss:$12 sps:$4 sm:$0xff]   ;;  %vm525_vm2 = vcmask 23552   ;;  %v501_v42 = vrot.slane %v1442_v2, 1 }
  0x59   : > { %255 = vperm.xlu0 %1092, %v1015_v9   ;;  %398 = vmatpush1.bf16.msra.mxu0 %v1105_v15  ;;  %v500_v35 = vsel %vm481_vm1, %v498_v33, %v497_v32  ;;  %v499_v41 = vsel %vm481_vm1, %v497_v32, %v498_v33  ;;  %v502_v43 = vrot.slane %v1444_v3, 1  ;;  %vm486_vm3 = vcmp.lt.s32.totalorder %v1454_v23, 7  ;;  %s1291_s25 = smov 3   ;;  %s191_s28 = sand.u32 1, %s1269_s13  }
  0x5a   : > { %399 = vmatprep.subr.bf16.mxu0 %v1107_v17  ;;  %980 = vmatprep.subr.bf16.mxu1 %v1286_v1  ;;  %v521_v38 = vsub.f32 %v1442_v2, %v500_v35  ;;  %v522_v44 = vsub.f32 %v1444_v3, %v499_v41  ;;  %v253_v54 = vand.u32 127, %v252_v21  ;;  %v1290_v60 = vmov 1.0|1.0   ;;  %s901_s30 = sshll.u32 %s191_s28, 3  ;;  %s950_s6 = sshll.u32 %s1337_s16, 7 }
  0x5b   : > { %509 = vrot.lane.b32.xlu1 %v1444_v3, %s1289_s20  ;;  %v503_v45 = vsel %vm486_vm3, %v501_v42, %v502_v43  ;;  %v504_v62 = vsel %vm486_vm3, %v502_v43, %v501_v42  ;;  %vm565_vm11 = vcmp.gt.f32.partialorder %v1442_v2, 0.5  ;;  %vm567_vm12 = vcmp.gt.s32.totalorder %v1454_v23, 0  ;;  %s193_s4 = scalar_lea.vmem [#allocation7], %s901_s30  ;;  %s1575_s8 = scalar_lea.hbm %s1621_s3, %s950_s6 }
  0x5c   : > { %981 = vmatpush3.bf16.msra.mxu1 %v1110_v20  ;;  %v523_v39 = vmul.f32 %v521_v38, %v521_v38  ;;  %v524_v46 = vmul.f32 %v522_v44, %v522_v44  ;;  %v532_v47 = vsub.f32 %v1442_v2, %v503_v45  ;;  %v533_v63 = vsub.f32 %v1444_v3, %v504_v62  ;;  %v1127_v45 = vld [vmem:[#allocation5] sm:$0xff]   ;;  %vm569_vm13 = vmand %vm567_vm12, %vm565_vm11  ;;  %s809_s5 = sshll.u32 %s193_s4, 4  ;;  %s1577_s9 = scalar_lea.sflag [#allocation4], %s191_s28  ;;  %s1570_s5 = int_to_ptr.vmem [resolvable:$true] %s809_s5 }
  0x5d   : > { %258 = vperm.xlu0 %1092, %v1017_v12   ;;  %400 = vmatpush1.bf16.msra.mxu0 %v1109_v18  ;;  %v1292_v44 = vmov 3   ;;  %s1207_s16 = scalar_lea.vmem %s1570_s5, 128  ;;  %p1634_p1 = scmp.ne.s32.totalorder %s1625_s22, 0 }
  0x5e   : > { %401 = vmatprep.subr.bf16.mxu0 %v1111_v22  ;;  %982 = vmatprep.subr.bf16.mxu1 %v1286_v1  ;;  %v526_v40 = vsel %vm525_vm2, %v523_v39, 0.0  ;;  %v529_v48 = vsel %vm525_vm2, %v524_v46, 0.0  ;;  %v534_v49 = vmul.f32 %v532_v47, %v532_v47  ;;  %v535_v0 = vmul.f32 %v533_v63, %v533_v63  ;;  %p1208_p12 = scmp.ne.s32.totalorder %s1570_s5, %s1207_s16  ;;  %s1293_s10 = smov [#allocation7]  }
  0x5f   : > { %1094 = vset.pattern.permute.xlu1 %v1292_v44  ;;  %s1211_s11 = sshll.u32 %s1293_s10, 4  ;;  %s1212_s11 = int_to_ptr.vmem [resolvable:$false] %s1211_s11 }
  0x60   : > { %983 = vmatpush3.bf16.msra.mxu1 %v1114_v25  ;;  %v536_v50 = vsel %vm525_vm2, %v534_v49, 0.0  ;;  %v539_v4 = vsel %vm525_vm2, %v535_v0, 0.0  ;;  %p1209_p2 = pnand %p1208_p12, %p1634_p1  ;;  %s1213_s24 = scalar_lea.vmem %s1212_s11, 256 }
  0x61   : > { %402 = vmatpush1.bf16.msra.mxu0 %v1113_v24  ;;  %984 = vmatprep.subr.bf16.mxu1 %v1286_v1  ;;  %p1214_p4 = scmp.lt.s32.totalorder %s1570_s5, %s1212_s11  ;;  %p1215_p7 = scmp.lt.s32.totalorder %s1213_s24, %s1207_s16 }
  0x62   : > { %403 = vmatprep.subr.bf16.mxu0 %v1115_v26  ;;  %1093 = vset.pattern.permute.xlu0 %v1292_v44  ;;  %p1210_p3 = pneg %p1209_p2 }
  0x63   : > { %p1216_p8 = por %p1215_p7, %p1214_p4 }
  0x64   : > { %985 = vmatpush3.bf16.msra.mxu1 %v1118_v28 }
  0x65   : > { %404 = vmatpush1.bf16.msra.mxu0 %v1117_v27  ;;  %986 = vmatprep.subr.bf16.mxu1 %v1286_v1  ;;  %p1217_p11 = pnand %p1216_p8, %p1210_p3 }
  0x66   : > { %405 = vmatprep.subr.bf16.mxu0 %v1119_v29 }
  0x68   : > { %987 = vmatpush3.bf16.msra.mxu1 %v1122_v31 }
  0x69   : > { %406 = vmatpush1.bf16.msra.mxu0 %v1121_v30  ;;  %988 = vmatprep.subr.bf16.mxu1 %v1286_v1 }
  0x6a   : > { %407 = vmatprep.subr.bf16.mxu0 %v1123_v34 }
  0x6c   : > { %989 = vmatpush3.bf16.msra.mxu1 %v1126_v37 }
  0x6d   : > { %408 = vmatpush1.bf16.msra.mxu0 %v1125_v36 }
  0x6e   : > { %994 = vmatprep.subr.bf16.mxu0 %v1286_v1 }
  0x7c   : > { %527 = vadd.xlane.f32.xlu0 %v526_v40 }
  0x7f   : > { %530 = vadd.xlane.f32.xlu1 %v529_v48 }
  0x80   : > { %540 = vadd.xlane.f32.xlu0 %v539_v4 }
  0x83   : > { %537 = vadd.xlane.f32.xlu1 %v536_v50 }
  0xc8   : > { %v1481_v51 = vpop.permute.xlu1 %507 }
  0xc9   : > { %v513_v53 = vrot.slane %v1481_v51, 7  ;;  %v517_v37 = vrot.slane %v1481_v51, 1 }
  0xcd   : > { %v1484_v55 = vpop.permute.xlu1 %509 }
  0xce   : > { %v514_v56 = vrot.slane %v1484_v55, 7  ;;  %v518_v38 = vrot.slane %v1484_v55, 1 }
  0xd0   : > { %v516_v58 = vsel %vm481_vm1, %v514_v56, %v513_v53  ;;  %v515_v61 = vsel %vm481_vm1, %v513_v53, %v514_v56  ;;  %v519_v39 = vsel %vm486_vm3, %v517_v37, %v518_v38  ;;  %v520_v40 = vsel %vm486_vm3, %v518_v38, %v517_v37 }
  0xd1   : > { %vm571_vm6 = vcmp.gt.f32.partialorder %v516_v58, 0.5  ;;  %vm587_vm8 = vcmp.gt.f32.partialorder %v519_v39, 0.5  ;;  %vm588_vm9 = vcmp.gt.f32.partialorder %v520_v40, 0.5  ;;  %vm572_vm10 = vcmp.gt.f32.partialorder %v515_v61, 0.5 }
  0xd2   : > { %v573_v59 = vsel %vm571_vm6, 1, %v1287_v19  ;;  %v589_v41 = vsel %vm587_vm8, 1, %v1287_v19  ;;  %v590_v42 = vsel %vm588_vm9, 1, %v1287_v19  ;;  %v574_v43 = vsel %vm572_vm10, 1, %v1287_v19 }
  0xd3   : > { %575 = vrot.lane.b32.xlu1 %v573_v59, %s1291_s25  ;;  %v564_v58 = vadd.s32 8, %v1454_v23 }
  0xd5   : > { %vm584_vm2 = vcmp.lt.s32.totalorder %v564_v58, 15 }
  0xd8   : > { %v256_v52 = vpop.permute.xlu0 %255 }
  0xd9   : > { %vm260_vm4 = vcmp.eq.s32.totalorder %v253_v54, %v256_v52 }
  0xdc   : > { %v259_v57 = vpop.permute.xlu0 %258 }
  0xdd   : > { %vm261_vm5 = vcmp.eq.s32.totalorder %v253_v54, %v259_v57 }
  0xde   : > { %vm928_vm7 = vmpackc.low %vm261_vm5, %vm260_vm4 }
  0xdf   : > { %929 = vmatmul.mubr.msk.bf16.vlgmr.msra.gmra.mrb[0].mxu0 %vm928_vm7, %v1290_v60  ;;  %991 = vmatmul.mubr.msk.bf16.vlgmr.msra.gmra.mrb[0].mxu1 %vm928_vm7, %v1290_v60 }
  0xe0   : > { %1010 = vmatprep.mubr.msk.bf16.mxu0 %vm1288_vm0, %v1286_v1  ;;  %995 = vmatpush3.bf16.msra.mxu0 %v1127_v45  ;;  %v1131_v45 = vld [vmem:[#allocation5 + $0x20] sm:$0xff]  }
  0xe1   : > { %996 = vmatprep.subr.bf16.mxu0 %v1286_v1 }
 0x109   : > { %v528_v48 = vpop.xlane.xlu0 %527 }
 0x10c   : > { %v531_v46 = vpop.xlane.xlu1 %530 }
 0x10d   : > { %v541_v50 = vpop.xlane.xlu0 %540 }
 0x110   : > { %v538_v47 = vpop.xlane.xlu1 %537 }
 0x145   : > { %v576_v49 = vpop.permute.xlu1 %575 }
 0x146   : > { %vm579_vm14 = vcmp.ne.s32.totalorder %v576_v49, 0 }
 0x147   : > { %vm581_vm15 = vmand %vm569_vm13, %vm579_vm14 }
 0x1b2   : > { %v427_v5 = vpop.f32.mrb[0].mxu0  ;;  %v1499_v6 = vpop.f32.mrb[0].mxu1 }
 0x1b3   : > { %v429_v7 = vpop.f32.mrb[1].mxu0  ;;  %v992_v8 = vpop.f32.mrb[1].mxu1  ;;  %v489_v9 = vrot.slane %v1499_v6, 7  ;;  %v493_v13 = vrot.slane %v1499_v6, 1 }
 0x1b4   : > { %v431_v10 = vpop.f32.mrb[2].mxu0  ;;  %v1502_v11 = vpop.f32.mrb[2].mxu1  ;;  %v542_v12 = vmul.f32 %v429_v7, %v427_v5  ;;  %v477_v14 = vrot.slane %v429_v7, 7  ;;  %v484_v20 = vrot.slane %v429_v7, 1 }
 0x1b5   : > { %v490_v15 = vrot.slane %v1502_v11, 7  ;;  %v494_v16 = vrot.slane %v1502_v11, 1  ;;  %v433_v17 = vpop.f32.mrb[3].mxu0  ;;  %v993_v18 = vpop.f32.mrb[3].mxu1 }
 0x1b6   : > { %v478_v21 = vrot.slane %v433_v17, 7  ;;  %v485_v22 = vrot.slane %v433_v17, 1  ;;  %544 = vadd.xlane.f32.xlu1 %v542_v12  ;;  %v543_v24 = vmul.f32 %v433_v17, %v431_v10 }
 0x1b7   : > { %v1509_v25 = vsel %vm481_vm1, %v489_v9, %v490_v15  ;;  %v1513_v26 = vsel %vm481_vm1, %v490_v15, %v489_v9  ;;  %v1517_v27 = vsel %vm486_vm3, %v494_v16, %v493_v13  ;;  %v1521_v28 = vsel %vm486_vm3, %v493_v13, %v494_v16 }
 0x1b8   : > { %546 = vadd.xlane.f32.xlu0 %v543_v24  ;;  %v487_v29 = vsel %vm486_vm3, %v484_v20, %v485_v22  ;;  %v483_v30 = vsel %vm481_vm1, %v478_v21, %v477_v14  ;;  %v482_v31 = vsel %vm481_vm1, %v477_v14, %v478_v21  ;;  %v488_v32 = vsel %vm486_vm3, %v485_v22, %v484_v20 }
 0x1b9   : > { %v556_v33 = vmul.f32 %v487_v29, %v427_v5  ;;  %v548_v34 = vmul.f32 %v483_v30, %v427_v5  ;;  %v549_v35 = vmul.f32 %v482_v31, %v431_v10  ;;  %v557_v36 = vmul.f32 %v488_v32, %v431_v10 }
 0x1ba   : > { %vm566_vm3 = vcmp.gt.f32.partialorder %v1444_v3, 0.5 }
 0x1bb   : > { %558 = vadd.xlane.f32.xlu1 %v556_v33  ;;  %vm586_vm4 = vmand %vm584_vm2, %vm566_vm3  ;;  %v1128_v33 = vld [vmem:[#allocation5 + $0x8] sm:$0xff]  }
 0x1bc   : > { %550 = vadd.xlane.f32.xlu0 %v548_v34  ;;  %997 = vmatpush3.bf16.msra.mxu0 %v1128_v33 }
 0x1bd   : > { %998 = vmatprep.subr.bf16.mxu0 %v1286_v1 }
 0x1c0   : > { %552 = vadd.xlane.f32.xlu0 %v549_v35  ;;  %v1129_v35 = vld [vmem:[#allocation5 + $0x10] sm:$0xff]  }
 0x1c1   : > { %999 = vmatpush3.bf16.msra.mxu0 %v1129_v35 }
 0x1c2   : > { %1000 = vmatprep.subr.bf16.mxu0 %v1286_v1 }
 0x1c4   : > { %560 = vadd.xlane.f32.xlu0 %v557_v36 }
 0x1cc   : > { %591 = vrot.lane.b32.xlu1 %v589_v41, %s1291_s25  ;;  %v1130_v41 = vld [vmem:[#allocation5 + $0x18] sm:$0xff]  }
 0x1cd   : > { %1001 = vmatpush3.bf16.msra.mxu0 %v1130_v41 }
 0x1ce   : > { %1002 = vmatprep.subr.bf16.mxu0 %v1286_v1 }
 0x1d0   : > { %593 = vrot.lane.b32.xlu1 %v590_v42, %s1291_s25 }
 0x1d1   : > { %1003 = vmatpush3.bf16.msra.mxu0 %v1131_v45 }
 0x1d2   : > { %1004 = vmatprep.subr.bf16.mxu0 %v1286_v1 }
 0x1da   : > { %577 = vrot.lane.b32.xlu0 %v574_v43, %s1291_s25 }
 0x243   : > { %v545_v51 = vpop.xlane.xlu1 %544 }
 0x244   : > { %v599_v55 = vsel %vm565_vm11, %v545_v51, -1e+30 }
 0x245   : > { %v547_v19 = vpop.xlane.xlu0 %546 }
 0x246   : > { %v600_v14 = vsel %vm566_vm3, %v547_v19, -1e+30 }
 0x248   : > { %v559_v52 = vpop.xlane.xlu1 %558 }
 0x249   : > { %v551_v53 = vpop.xlane.xlu0 %550  ;;  %v562_v59 = vsub.f32 %v559_v52, %v538_v47 }
 0x24a   : > { %v554_v54 = vsub.f32 %v551_v53, %v528_v48  ;;  %v1133_v48 = vld [vmem:[#allocation5 + $0x30] sm:$0xff]  }
 0x24c   : > { %v601_v56 = vsel %vm581_vm15, %v554_v54, -1e+30  ;;  %v592_v57 = vpop.permute.xlu1 %591 }
 0x24d   : > { %v605_v60 = vmax.f32 %v599_v55, %v601_v56  ;;  %vm595_vm0 = vcmp.ne.s32.totalorder %v592_v57, 0  ;;  %v553_v61 = vpop.xlane.xlu0 %552 }
 0x24e   : > { %vm597_vm1 = vmand %vm565_vm11, %vm595_vm0  ;;  %v555_v9 = vsub.f32 %v553_v61, %v531_v46  ;;  %v1132_v46 = vld [vmem:[#allocation5 + $0x28] sm:$0xff]  }
 0x24f   : > { %v603_v62 = vsel %vm597_vm1, %v562_v59, -1e+30  ;;  %1005 = vmatpush3.bf16.msra.mxu0 %v1132_v46 }
 0x250   : > { %v607_v63 = vmax.f32 %v605_v60, %v603_v62  ;;  %v594_v0 = vpop.permute.xlu1 %593  ;;  %1006 = vmatprep.subr.bf16.mxu0 %v1286_v1 }
 0x251   : > { %v561_v4 = vpop.xlane.xlu0 %560  ;;  %vm596_vm5 = vcmp.ne.s32.totalorder %v594_v0, 0 }
 0x252   : > { %v609_v5 = vsub.f32 %v599_v55, %v607_v63  ;;  %v615_v7 = vsub.f32 %v601_v56, %v607_v63  ;;  %v621_v12 = vsub.f32 %v603_v62, %v607_v63  ;;  %vm598_vm6 = vmand %vm586_vm4, %vm596_vm5  ;;  %v563_v13 = vsub.f32 %v561_v4, %v541_v50  ;;  %v1134_v50 = vld [vmem:[#allocation5 + $0x38] sm:$0xff]  }
 0x253   : > { %1007 = vmatpush3.bf16.msra.mxu0 %v1133_v48 }
 0x254   : > { %v611_v8 = vmul.f32 1.442695, %v609_v5  ;;  %v617_v23 = vmul.f32 1.442695, %v615_v7  ;;  %v623_v17 = vmul.f32 1.442695, %v621_v12  ;;  %1008 = vmatprep.subr.bf16.mxu0 %v1286_v1 }
 0x255   : > { %v578_v10 = vpop.permute.xlu0 %577  ;;  %v604_v18 = vsel %vm598_vm6, %v563_v13, -1e+30 }
 0x256   : > { %1135 = vpow2.f32 %v611_v8  ;;  %vm580_vm7 = vcmp.ne.s32.totalorder %v578_v10, 0 }
 0x257   : > { %vm582_vm8 = vmand %vm566_vm3, %vm580_vm7  ;;  %1137 = vpow2.f32 %v617_v23  ;;  %1009 = vmatpush3.bf16.msra.mxu0 %v1134_v50 }
 0x258   : > { %v602_v15 = vsel %vm582_vm8, %v555_v9, -1e+30  ;;  %1139 = vpow2.f32 %v623_v17 }
 0x259   : > { %v606_v16 = vmax.f32 %v600_v14, %v602_v15 }
 0x25b   : > { %v608_v20 = vmax.f32 %v606_v16, %v604_v18 }
 0x25d   : > { %v610_v21 = vsub.f32 %v600_v14, %v608_v20  ;;  %v616_v22 = vsub.f32 %v602_v15, %v608_v20  ;;  %v622_v24 = vsub.f32 %v604_v18, %v608_v20 }
 0x25f   : > { %v613_v29 = vmul.f32 1.442695, %v610_v21  ;;  %v619_v30 = vmul.f32 1.442695, %v616_v22  ;;  %v625_v32 = vmul.f32 1.442695, %v622_v24 }
 0x260   : > { %v1136_v31 = vpop.eup %1135 }
 0x261   : > { %1141 = vpow2.f32 %v613_v29  ;;  %635 = vperm.xlu0 %1093, %v1136_v31   ;;  %v1138_v34 = vpop.eup %1137 }
 0x262   : > { %1143 = vpow2.f32 %v619_v30  ;;  %v627_v36 = vadd.f32 %v1138_v34, %v1136_v31  ;;  %v1140_v37 = vpop.eup %1139 }
 0x263   : > { %1145 = vpow2.f32 %v625_v32 }
 0x264   : > { %v629_v38 = vadd.f32 %v1140_v37, %v627_v36 }
 0x266   : > { %1147 = vrcp.f32 %v629_v38 }
 0x26b   : > { %v1142_v39 = vpop.eup %1141 }
 0x26c   : > { %v1144_v40 = vpop.eup %1143  ;;  %640 = vperm.xlu1 %1094, %v1142_v39  }
 0x26d   : > { %v628_v42 = vadd.f32 %v1144_v40, %v1142_v39  ;;  %652 = vperm.xlu0 %1093, %v1144_v40   ;;  %v1146_v43 = vpop.eup %1145 }
 0x26f   : > { %v630_v44 = vadd.f32 %v1146_v43, %v628_v42 }
 0x270   : > { %647 = vperm.xlu1 %1094, %v1138_v34   ;;  %v1148_v47 = vpop.eup %1147 }
 0x271   : > { %1149 = vrcp.f32 %v630_v44  ;;  %666 = vperm.xlu0 %1093, %v1146_v43  }
 0x274   : > { %661 = vperm.xlu1 %1094, %v1140_v37  }
 0x278   : > { %675 = vperm.xlu1 %1094, %v1148_v47  }
 0x27b   : > { %v1150_v49 = vpop.eup %1149 }
 0x27c   : > { %680 = vperm.xlu0 %1093, %v1150_v49   ;;  %776 = vperm.xlu1 %1094, %v1442_v2  }
 0x280   : > { %780 = vperm.xlu0 %1093, %v1444_v3  }
 0x2e0   : > { %v636_v51 = vpop.permute.xlu0 %635 }
 0x2e1   : > { %v643_v57 = vmul.f32 %v636_v51, %v1499_v6 }
 0x2eb   : > { %v641_v19 = vpop.permute.xlu1 %640 }
 0x2ec   : > { %v644_v52 = vmul.f32 %v641_v19, %v1502_v11  ;;  %v653_v53 = vpop.permute.xlu0 %652 }
 0x2ed   : > { %v656_v54 = vmul.f32 %v653_v53, %v1509_v25 }
 0x2ef   : > { %v658_v55 = vadd.f32 %v656_v54, %v644_v52  ;;  %v648_v56 = vpop.permute.xlu1 %647 }
 0x2f0   : > { %v655_v1 = vmul.f32 %v648_v56, %v1513_v26  ;;  %v667_v58 = vpop.permute.xlu0 %666 }
 0x2f1   : > { %v670_v2 = vmul.f32 %v667_v58, %v1517_v27 }
 0x2f2   : > { %v657_v59 = vadd.f32 %v655_v1, %v643_v57 }
 0x2f3   : > { %v662_v60 = vpop.permute.xlu1 %661  ;;  %v672_v3 = vadd.f32 %v670_v2, %v658_v55 }
 0x2f4   : > { %v669_v61 = vmul.f32 %v662_v60, %v1521_v28 }
 0x2f6   : > { %v671_v11 = vadd.f32 %v669_v61, %v657_v59 }
 0x2f7   : > { %v676_v62 = vpop.permute.xlu1 %675 }
 0x2f8   : > { %v683_v25 = vmul.f32 %v676_v62, %v671_v11 }
 0x2fb   : > { %v681_v63 = vpop.permute.xlu0 %680  ;;  %v777_v26 = vpop.permute.xlu1 %776 }
 0x2fc   : > { %v684_v0 = vmul.f32 %v681_v63, %v672_v3 }
 0x2fe   : > { %v685_v4 = vpack.c.bf16 %v684_v0, %v683_v25 }
 0x2ff   : > { %v781_v27 = vpop.permute.xlu0 %780 }
 0x300   : > { %1011 = vmatmul.mubr.bf16.vlgmr.msra.gmra.mrb[4].mxu0 %v685_v4 }
 0x3d3   : > { %v768_v6 = vpop.f32.mrb[4].mxu0 }
 0x3d4   : > { %v1012_v5 = vpop.f32.mrb[5].mxu0  ;;  %v783_v8 = vmul.f32 %v777_v26, %v768_v6 }
 0x3d5   : > { %v771_v7 = vpop.f32.mrb[6].mxu0 }
 0x3d6   : > { %v784_v28 = vmul.f32 %v781_v27, %v771_v7  ;;  %v1013_v23 = vpop.f32.mrb[7].mxu0 }
 0x3d8   : > { %v954_v9 = vpack.c.bf16 %v784_v28, %v783_v8 }
 0x3da   : > { %955 = vst [vmem:[%s193_s4] sm:$0xff] %v954_v9  }
 0x3db   : > { %1220 = shalt.err (!%p1217_p11)
}
 0x3dc   : > { %s1221_s27 = scalar_lea.hbm %s1575_s8, 128  ;;  %s1225_s19 = scalar_lea.hbm %s1621_s3, 256 }
 0x3dd   : > { %p1222_p13 = scmp.ne.s32.totalorder %s1575_s8, %s1221_s27  ;;  %p1226_p6 = scmp.lt.u32.totalorder %s1575_s8, %s1621_s3 }
 0x3de   : > { %p1227_p9 = scmp.lt.u32.totalorder %s1225_s19, %s1221_s27  ;;  %p1229_p12 = scmp.lt.u32.totalorder %s1221_s27, %s1575_s8 }
 0x3df   : > { %p1223_p0 = pnand %p1222_p13, %p1634_p1 }
 0x3e0   : > { %p1228_p10 = por %p1227_p9, %p1226_p6 }
 0x3e1   : > { %p1224_p5 = pneg %p1223_p0 }
 0x3e2   : > { %p1230_p2 = por %p1229_p12, %p1228_p10 }
 0x3e4   : > { %p1231_p3 = pnand %p1230_p2, %p1224_p5 }
 0x3e6   : > { %1234 = shalt.err (!%p1231_p3)
}
 0x3e7   : > { %s1294_s28 = smov 64   ;;  %s1295_s30 = smov 4  }
 0x3e8   : > { %1026 = dma.vmem_to_hbm [thread:$0]  (%p1634_p1), %s1570_s5, 128, %s1575_s8, %s1577_s9, %s1294_s28, %s1294_s28, %s1295_s30  }
 0x3e9 PF: > { %p1043_p4 = scmp.ge.s32.totalorder %s1277_s15, 2  ;;  %s824_s4 = sand.u32 1, %s1265_s12  }
 0x3ea   : > { %p1635_p7 = scmp.ne.s32.totalorder %s1626_s23, 0  ;;  %s825_s6 = scalar_lea.sflag [#allocation4], %s824_s4 }
 0x3ec   : > { %p1036_p8 = pnand %p1043_p4, %p1635_p7 }
 0x3ee   : > { %1260 = dma.done.wait (!%p1036_p8), %s825_s6, 128  }
 0x3ef   : > { %1262 = vsyncadd (!%p1036_p8), %s825_s6, 4294967168  ;;  %p15_p11 = scmp.ge.s32.totalorder %s1341_s18, 4   ;;  %s1636_s12 = smov %s1269_s13 }
 0x3f0   : > { %s1637_s13 = smov %s1273_s14  ;;  %s1638_s14 = smov %s1352_s21 }
 0x3f1   : > { %s1639_s15 = smov %s1341_s18  ;;  %17 = sbr.rel (!%p15_p11) target bundleno = 5 (0x5), region = 76 }
 0x3f8   :  { %830 = vsyncpa [#allocation3], 1 }
 0x3f9   :  { %832 = vsyncpa [#allocation3 + $0x1], 1 }
 0x3fa   :  { %833 = vsyncpa [#allocation6], 1 }
 0x3fb   :  { %834 = vsyncpa [#allocation4], 1 }
 0x3fc   :  { %836 = vsyncpa [#allocation4 + $0x1], 1 }

</bundles_post_ra>
